<compile_context>
chip_gen: v5e
topology: v5e:2x2
jax: 0.10.0
libtpu: 0.0.40
codegen_flags: <defaults>
</compile_context>

<pallas_src>
import functools

import jax
import jax.numpy as jnp
from jax.experimental import pallas as pl
from jax.experimental.pallas import tpu as pltpu


def _round_up(n, m):
    return ((n + m - 1) // m) * m


def _cdiv(a, b):
    return (a + b - 1) // b


# ----------------------------- fused Pallas kernel -------------------------- #

def _fused_snn_kernel(x_ref, w1_ref, b1_ref, w2_ref, b2_ref, w3_ref, b3_ref,
                      out_ref, *, t_max1, t_max2):
    """Fused 3-layer TTFS SpikingDense forward for one batch tile.

    Time shifts are pre-folded into the bias rows (f32), and the output-layer
    weights are pre-negated, so the body is dot -> add bias -> min per layer.
    t_max1 / t_max2 are Python floats baked in at trace time.
    """
    mxu_dtype = w1_ref.dtype  # bf16 (default) or f32; accumulation always f32

    # Hidden layer 1:  ti = x @ W1 + (t_max1 - D1 - t_min1*colsum(W1)); clamp.
    h = jnp.dot(x_ref[...].astype(mxu_dtype), w1_ref[...],
                preferred_element_type=jnp.float32)
    h = jnp.minimum(h + b1_ref[...], t_max1)

    # Hidden layer 2.
    h = jnp.dot(h.astype(mxu_dtype), w2_ref[...],
                preferred_element_type=jnp.float32)
    h = jnp.minimum(h + b2_ref[...], t_max2)

    # Output layer:  out = h @ (-W3) + (alpha_scale*D3 + t_min3*colsum(W3)).
    o = jnp.dot(h.astype(mxu_dtype), w3_ref[...],
                preferred_element_type=jnp.float32)
    out_ref[...] = o + b3_ref[...]


# ------------------------------ batch tiling -------------------------------- #

def _batch_tiling(batch, max_tb):
    """Pick (tile_rows, padded_batch): even tile count when batch > 8 so both
    v7x TensorCores engage; near-equal tiles minimize padded-row waste."""
    b8 = _round_up(max(batch, 1), 8)
    if b8 <= 8:
        return 8, 8
    n_tiles = max(2, _cdiv(b8, max_tb))
    n_tiles = _round_up(n_tiles, 2)          # even grid length
    tb = _round_up(_cdiv(b8, n_tiles), 8)
    return tb, n_tiles * tb


# ------------------------------ fused wrapper ------------------------------- #

def snn_forward_fused(x, padded_params, hidden_t_max, num_classes, *, max_tb=2048):
    """Run the fused SNN stack. x: (B, in_dim) float array."""
    batch, in_dim = x.shape
    (w1, b1), (w2, b2), (w3, b3) = padded_params
    h1_p = w1.shape[1]
    h2_p = w2.shape[1]
    out_p = w3.shape[1]
    assert w1.shape[0] == in_dim

    tb, bp = _batch_tiling(batch, max_tb)

    xp = x if x.dtype == jnp.float32 else x.astype(jnp.float32)
    if bp != batch:
        # Batch-axis padding only; skipped entirely when B is already tileable.
        xp = jnp.pad(xp, ((0, bp - batch), (0, 0)))

    # Real (post-optimization) FLOP / byte counts.
    flops = 2 * bp * (in_dim * h1_p + h1_p * h2_p + h2_p * out_p)
    bytes_accessed = (bp * in_dim * 4 + bp * out_p * 4
                      + sum(int(a.size) * a.dtype.itemsize
                            for a in (w1, b1, w2, b2, w3, b3)))
    cost = pl.CostEstimate(flops=flops, transcendentals=0,
                           bytes_accessed=bytes_accessed)

    kernel = functools.partial(_fused_snn_kernel,
                               t_max1=hidden_t_max[0], t_max2=hidden_t_max[1])

    # Weight/bias blocks never change across grid steps -> single buffer.
    const = dict(pipeline_mode=pl.Buffered(buffer_count=1))

    out = pl.pallas_call(
        kernel,
        out_shape=jax.ShapeDtypeStruct((bp, out_p), jnp.float32),
        grid=(bp // tb,),
        in_specs=[
            pl.BlockSpec((tb, in_dim), lambda b: (b, 0)),             # x tile
            pl.BlockSpec((in_dim, h1_p), lambda b: (0, 0), **const),  # W1
            pl.BlockSpec((1, h1_p), lambda b: (0, 0), **const),       # b1
            pl.BlockSpec((h1_p, h2_p), lambda b: (0, 0), **const),    # W2
            pl.BlockSpec((1, h2_p), lambda b: (0, 0), **const),       # b2
            pl.BlockSpec((h2_p, out_p), lambda b: (0, 0), **const),   # -W3
            pl.BlockSpec((1, out_p), lambda b: (0, 0), **const),      # b3
        ],
        out_specs=pl.BlockSpec((tb, out_p), lambda b: (b, 0)),
        compiler_params=pltpu.CompilerParams(
            dimension_semantics=("parallel",)),  # shard batch tiles across TCs
        cost_estimate=cost,
    )(xp, w1, b1, w2, b2, w3, b3)

    # TODO(synk): if hidden dims are ever scaled to >=2K, add a K/N grid axis
    # for the weights (and set vmem_limit_bytes) instead of keeping all three
    # weight matrices VMEM-resident.
    return out[:batch, :num_classes]


# -------------------------------- SNN model --------------------------------- #

class SNNModelPallas:
    """Equivalent of SNNModel: 2 hidden SpikingDense layers + 1 output layer.

    The torch SNNModel starts with an empty ModuleList; here we instantiate a
    concrete small network with deterministic glorot_uniform init (D_i zeros),
    as SpikingDense.__init__ prescribes. robustness_params is assumed empty
    (quant / noise branches statically elided).
    """

    B_N = 1.5  # SpikingDense.B_n

    def __init__(self, key, input_dim=16, hidden=(32, 32), num_classes=10,
                 mxu_dtype=jnp.bfloat16):
        dims = [input_dim] + list(hidden) + [num_classes]
        assert len(dims) == 4, "fused kernel implements 2 hidden + 1 output layer"
        self.num_classes = num_classes
        self.robustness_params = {}
        assert not self.robustness_params, "quant/noise branches not implemented"

        # Static TTFS schedule (set_params semantics): t_max = t_min + B_n.
        schedule = []
        t_min_prev, t_min = 0.0, 1.0
        for _ in range(len(dims) - 1):
            t_max = t_min + self.B_N
            schedule.append((t_min_prev, t_min, t_max))
            t_min_prev, t_min = t_min, t_max
        self.hidden_t_max = (schedule[0][2], schedule[1][2])

        self.layers = []   # unpadded f32 params (pure-JAX reference check)
        self.padded = []   # lane-dense, bias-folded params for the kernel
        prev_padded = input_dim            # layer-0 input dim is NOT padded
        for i in range(len(dims) - 1):
            key, sub = jax.random.split(key)
            fan_in, fan_out = dims[i], dims[i + 1]
            limit = float((6.0 / (fan_in + fan_out)) ** 0.5)  # glorot_uniform
            w = jax.random.uniform(sub, (fan_in, fan_out), jnp.float32,
                                   minval=-limit, maxval=limit)
            d_i = jnp.zeros((fan_out,), jnp.float32)          # torch.zeros init
            is_output = i == len(dims) - 2
            self.layers.append((w, d_i, is_output))

            t_prev, t_lo, t_hi = schedule[i]
            out_padded = _round_up(fan_out, 128)
            wp = jnp.zeros((prev_padded, out_padded), jnp.float32)
            wp = wp.at[:fan_in, :fan_out].set(w)
            dp = jnp.zeros((1, out_padded), jnp.float32).at[0, :fan_out].set(d_i)
            colsum = jnp.sum(wp, axis=0, keepdims=True)       # f32 column sums
            if not is_output:
                # ti = x @ W + b ;  b = t_max - D - t_min*colsum(W)
                bias = t_hi - dp - t_lo * colsum
                w_kernel = wp
            else:
                # out = x @ (-W) + b ;  b = alpha_scale*D + t_min*colsum(W)
                alpha_scale = (t_lo - t_prev) / (t_lo - t_prev + 1e-10)
                bias = alpha_scale * dp + t_lo * colsum
                w_kernel = -wp
            self.padded.append((w_kernel.astype(mxu_dtype),
                                bias.astype(jnp.float32)))
            prev_padded = out_padded

    def __call__(self, x):
        return snn_forward_fused(x, self.padded, self.hidden_t_max,
                                 self.num_classes)


# ------------------------- pure-JAX reference check -------------------------- #

def reference_forward(x, layers, b_n=1.5):
    hi = jax.lax.Precision.HIGHEST   # keep the reference f32-exact on TPU
    t_min_prev, t_min = 0.0, 1.0
    for (w, d_i, is_output) in layers:
        t_max = t_min + b_n
        if not is_output:
            threshold = t_max - t_min - d_i
            ti = jnp.matmul(x - t_min, w, precision=hi) + threshold + t_min
            x = jnp.where(ti < t_max, ti, t_max)
        else:
            w_mult_x = jnp.matmul(t_min - x, w, precision=hi)
            alpha = d_i / (t_min - t_min_prev + 1e-10)
            x = alpha * (t_min - t_min_prev) + w_mult_x
        t_min_prev, t_min = t_min, t_max
    return x


# ----------------------------------- main ------------------------------------ #

if __name__ == "__main__":
    key = jax.random.PRNGKey(0)
    key_model, key_x = jax.random.split(key)

    batch, input_dim = 8, 16
    # TTFS spike times of the input layer lie in [t_min_prev, t_min] = [0, 1].
    x = jax.random.uniform(key_x, (batch, input_dim), jnp.float32,
                           minval=0.0, maxval=1.0)

    # 1) f32-MXU model: exact check of the fused kernel's plumbing
    #    (tiling, batch padding, bias folding) against the pure-JAX reference.
    model_f32 = SNNModelPallas(key_model, input_dim=input_dim, hidden=(32, 32),
                               num_classes=10, mxu_dtype=jnp.float32)
    out_f32 = jax.block_until_ready(model_f32(x))
    ref = reference_forward(x, model_f32.layers)
    assert out_f32.shape == (batch, 10)
    assert jnp.allclose(out_f32, ref, atol=1e-4, rtol=1e-4), "f32 mismatch vs reference"

    # 2) bf16-MXU model (shipping default): same weights, deterministic init,
    #    only bf16-quantization-level deviation from the f32 reference expected.
    model_bf16 = SNNModelPallas(key_model, input_dim=input_dim, hidden=(32, 32),
                                num_classes=10)
    out_bf16 = jax.block_until_ready(model_bf16(x))
    assert out_bf16.shape == (batch, 10)
    max_err = float(jnp.max(jnp.abs(out_bf16 - ref)))
    assert max_err < 0.2, f"bf16 deviation too large: {max_err}"

    print("KERNEL_OK")
</pallas_src>

<mosaic_0001>
module attributes {stable_mosaic.version = 11 : i64} {
  func.func @_fused_snn_kernel(%arg0: i32, %arg1: memref<8x16xf32, #tpu.memory_space<vmem>>, %arg2: memref<16x128xf32, #tpu.memory_space<vmem>>, %arg3: memref<1x128xf32, #tpu.memory_space<vmem>>, %arg4: memref<128x128xf32, #tpu.memory_space<vmem>>, %arg5: memref<1x128xf32, #tpu.memory_space<vmem>>, %arg6: memref<128x128xf32, #tpu.memory_space<vmem>>, %arg7: memref<1x128xf32, #tpu.memory_space<vmem>>, %arg8: memref<8x128xf32, #tpu.memory_space<vmem>>) attributes {dimension_semantics = [#tpu.dimension_semantics<parallel>], iteration_bounds = array<i64: 1>, scalar_prefetch = 0 : i64, scratch_operands = 0 : i64, tpu.core_type = #tpu.core_type<tc>, window_params = [{transform_indices = @transform_0, window_bounds = array<i64: 8, 16>}, {pipeline_mode = #tpu.pipeline_mode<synchronous>, transform_indices = @transform_1, window_bounds = array<i64: 16, 128>}, {pipeline_mode = #tpu.pipeline_mode<synchronous>, transform_indices = @transform_2, window_bounds = array<i64: 1, 128>}, {pipeline_mode = #tpu.pipeline_mode<synchronous>, transform_indices = @transform_3, window_bounds = array<i64: 128, 128>}, {pipeline_mode = #tpu.pipeline_mode<synchronous>, transform_indices = @transform_4, window_bounds = array<i64: 1, 128>}, {pipeline_mode = #tpu.pipeline_mode<synchronous>, transform_indices = @transform_5, window_bounds = array<i64: 128, 128>}, {pipeline_mode = #tpu.pipeline_mode<synchronous>, transform_indices = @transform_6, window_bounds = array<i64: 1, 128>}, {transform_indices = @transform_7, window_bounds = array<i64: 8, 128>}]} {
    %c0 = arith.constant 0 : index
    %c0_0 = arith.constant 0 : index
    %0 = vector.load %arg1[%c0, %c0_0] : memref<8x16xf32, #tpu.memory_space<vmem>>, vector<8x16xf32>
    %c0_1 = arith.constant 0 : index
    %c0_2 = arith.constant 0 : index
    %1 = vector.load %arg2[%c0_1, %c0_2] : memref<16x128xf32, #tpu.memory_space<vmem>>, vector<16x128xf32>
    %cst = arith.constant dense<0.000000e+00> : vector<8x128xf32>
    %2 = tpu.matmul %0, %1, %cst {dimension_numbers = #tpu.dot_dimension_numbers<[1], [0], [0], [1], [0, 0, 1, 1], [], []>} : vector<8x16xf32>, vector<16x128xf32>, vector<8x128xf32> -> vector<8x128xf32>
    %c0_3 = arith.constant 0 : index
    %c0_4 = arith.constant 0 : index
    %3 = vector.load %arg3[%c0_3, %c0_4] : memref<1x128xf32, #tpu.memory_space<vmem>>, vector<1x128xf32>
    %4 = vector.broadcast %3 : vector<1x128xf32> to vector<8x128xf32>
    %5 = arith.addf %2, %4 : vector<8x128xf32>
    %cst_5 = arith.constant 2.500000e+00 : f32
    %6 = vector.broadcast %cst_5 : f32 to vector<8x128xf32>
    %7 = arith.minimumf %5, %6 : vector<8x128xf32>
    %c0_6 = arith.constant 0 : index
    %c0_7 = arith.constant 0 : index
    %8 = vector.load %arg4[%c0_6, %c0_7] : memref<128x128xf32, #tpu.memory_space<vmem>>, vector<128x128xf32>
    %cst_8 = arith.constant dense<0.000000e+00> : vector<8x128xf32>
    %9 = tpu.matmul %7, %8, %cst_8 {dimension_numbers = #tpu.dot_dimension_numbers<[1], [0], [0], [1], [0, 0, 1, 1], [], []>} : vector<8x128xf32>, vector<128x128xf32>, vector<8x128xf32> -> vector<8x128xf32>
    %c0_9 = arith.constant 0 : index
    %c0_10 = arith.constant 0 : index
    %10 = vector.load %arg5[%c0_9, %c0_10] : memref<1x128xf32, #tpu.memory_space<vmem>>, vector<1x128xf32>
    %11 = vector.broadcast %10 : vector<1x128xf32> to vector<8x128xf32>
    %12 = arith.addf %9, %11 : vector<8x128xf32>
    %cst_11 = arith.constant 4.000000e+00 : f32
    %13 = vector.broadcast %cst_11 : f32 to vector<8x128xf32>
    %14 = arith.minimumf %12, %13 : vector<8x128xf32>
    %c0_12 = arith.constant 0 : index
    %c0_13 = arith.constant 0 : index
    %15 = vector.load %arg6[%c0_12, %c0_13] : memref<128x128xf32, #tpu.memory_space<vmem>>, vector<128x128xf32>
    %cst_14 = arith.constant dense<0.000000e+00> : vector<8x128xf32>
    %16 = tpu.matmul %14, %15, %cst_14 {dimension_numbers = #tpu.dot_dimension_numbers<[1], [0], [0], [1], [0, 0, 1, 1], [], []>} : vector<8x128xf32>, vector<128x128xf32>, vector<8x128xf32> -> vector<8x128xf32>
    %c0_15 = arith.constant 0 : index
    %c0_16 = arith.constant 0 : index
    %17 = vector.load %arg7[%c0_15, %c0_16] : memref<1x128xf32, #tpu.memory_space<vmem>>, vector<1x128xf32>
    %18 = vector.broadcast %17 : vector<1x128xf32> to vector<8x128xf32>
    %19 = arith.addf %16, %18 : vector<8x128xf32>
    %c0_17 = arith.constant 0 : index
    %c0_18 = arith.constant 0 : index
    %20 = vector.load %arg8[%c0_17, %c0_18] : memref<8x128xf32, #tpu.memory_space<vmem>>, vector<8x128xf32>
    tpu.vector_store %arg8[%c0_17, %c0_18], %19 {strides = array<i32>} : memref<8x128xf32, #tpu.memory_space<vmem>>, vector<8x128xf32>,
    return
  }
  func.func @transform_0(%arg0: i32) -> (i32, i32) {
    %c0_i32 = arith.constant 0 : i32
    %c0_i32_0 = arith.constant 0 : i32
    return %arg0, %c0_i32 : i32, i32
  }
  func.func @transform_1(%arg0: i32) -> (i32, i32) {
    %c0_i32 = arith.constant 0 : i32
    %c0_i32_0 = arith.constant 0 : i32
    %c0_i32_1 = arith.constant 0 : i32
    return %c0_i32, %c0_i32_0 : i32, i32
  }
  func.func @transform_2(%arg0: i32) -> (i32, i32) {
    %c0_i32 = arith.constant 0 : i32
    %c0_i32_0 = arith.constant 0 : i32
    %c0_i32_1 = arith.constant 0 : i32
    return %c0_i32, %c0_i32_0 : i32, i32
  }
  func.func @transform_3(%arg0: i32) -> (i32, i32) {
    %c0_i32 = arith.constant 0 : i32
    %c0_i32_0 = arith.constant 0 : i32
    %c0_i32_1 = arith.constant 0 : i32
    return %c0_i32, %c0_i32_0 : i32, i32
  }
  func.func @transform_4(%arg0: i32) -> (i32, i32) {
    %c0_i32 = arith.constant 0 : i32
    %c0_i32_0 = arith.constant 0 : i32
    %c0_i32_1 = arith.constant 0 : i32
    return %c0_i32, %c0_i32_0 : i32, i32
  }
  func.func @transform_5(%arg0: i32) -> (i32, i32) {
    %c0_i32 = arith.constant 0 : i32
    %c0_i32_0 = arith.constant 0 : i32
    %c0_i32_1 = arith.constant 0 : i32
    return %c0_i32, %c0_i32_0 : i32, i32
  }
  func.func @transform_6(%arg0: i32) -> (i32, i32) {
    %c0_i32 = arith.constant 0 : i32
    %c0_i32_0 = arith.constant 0 : i32
    %c0_i32_1 = arith.constant 0 : i32
    return %c0_i32, %c0_i32_0 : i32, i32
  }
  func.func @transform_7(%arg0: i32) -> (i32, i32) {
    %c0_i32 = arith.constant 0 : i32
    %c0_i32_0 = arith.constant 0 : i32
    return %arg0, %c0_i32 : i32, i32
  }
}

</mosaic_0001>

<bundles_post_ra>
// kernel: tpu_custom_call.1
= control target key start
LH: loop header
LB: loop body
LE: loop exit
PB: predicated region body
PF: predicated region fallthrough
CT: control target
= control target key end

     0   :  { %12 = vsyncpa [#allocation3], 0  ;;  %s431_s0 = inlined_call_operand.hbm [shape: f32[8,16], index: 0, kind: input, shape index: {}]   ;;  %s432_s1 = inlined_call_operand.hbm [shape: f32[16,128], index: 1, kind: input, shape index: {}]   ;;  %s433_s2 = inlined_call_operand.vmem [shape: f32[1,128], index: 2, kind: input, shape index: {}]   ;;  %s434_s3 = inlined_call_operand.hbm [shape: f32[128,128], index: 3, kind: input, shape index: {}]   ;;  %s435_s4 = inlined_call_operand.vmem [shape: f32[1,128], index: 4, kind: input, shape index: {}]   ;;  %s436_s5 = inlined_call_operand.hbm [shape: f32[128,128], index: 5, kind: input, shape index: {}]   ;;  %s437_s6 = inlined_call_operand.vmem [shape: f32[1,128], index: 6, kind: input, shape index: {}]   ;;  %s438_s7 = inlined_call_operand.hbm [shape: f32[8,128], index: 7, kind: output, shape index: {}]  }
   0x1   :  { %13 = vsyncpa [#allocation6], 0 }
   0x2   :  { %14 = vsyncpa [#allocation9], 0  ;;  %s31_s26 = sshll.u32 %s432_s1, 4  ;;  %s32_s26 = int_to_ptr.hbm [resolvable:$true] %s31_s26 }
   0x3   :  { %15 = vsyncpa [#allocation4], 0  ;;  %s360_s27 = smov [#allocation5]   ;;  %s21_s8 = sshll.u32 %s431_s0, 4  ;;  %s22_s8 = int_to_ptr.hbm [resolvable:$true] %s21_s8 }
   0x4   :  { %s33_s28 = sshll.u32 %s360_s27, 4  ;;  %s361_s9 = smov 128   ;;  %s34_s28 = int_to_ptr.vmem [resolvable:$true] %s33_s28 }
   0x5   :  { %s362_s10 = smov 8   ;;  %s363_s11 = smov [#allocation2]  }
   0x6   :  { %39 = dma.hbm_to_vmem [thread:$0]  %s32_s26, 256, %s34_s28, [#allocation6], %s361_s9, %s361_s9, %s362_s10  }
   0x7   :  { %s23_s12 = sshll.u32 %s363_s11, 4  ;;  %s46_s15 = sshll.u32 %s434_s3, 4  ;;  %s24_s12 = int_to_ptr.vmem [resolvable:$true] %s23_s12  ;;  %s47_s15 = int_to_ptr.hbm [resolvable:$true] %s46_s15 }
   0x8   :  { %26 = dma.hbm_to_vmem [thread:$0]  %s22_s8, 128, %s24_s12, [#allocation3]  }
   0x9   :  { %s61_s17 = sshll.u32 %s436_s5, 4  ;;  %s364_s18 = smov [#allocation7]   ;;  %s62_s17 = int_to_ptr.hbm [resolvable:$true] %s61_s17 }
   0xa   :  { %s48_s19 = sshll.u32 %s364_s18, 4  ;;  %s365_s0 = smov [#allocation8]   ;;  %s49_s19 = int_to_ptr.vmem [resolvable:$true] %s48_s19 }
   0xb   :  { %54 = dma.hbm_to_vmem [thread:$0]  %s47_s15, 2048, %s49_s19, [#allocation6], %s361_s9, %s361_s9, %s362_s10  }
   0xc   :  { %s63_s20 = sshll.u32 %s365_s0, 4  ;;  %s64_s20 = int_to_ptr.vmem [resolvable:$true] %s63_s20 }
   0xd   :  { %69 = dma.hbm_to_vmem [thread:$0]  %s62_s17, 2048, %s64_s20, [#allocation9], %s361_s9, %s361_s9, %s362_s10  }
   0xe   :  { %352 = dma.done.wait [#allocation3], 128  }
   0xf   :  { %353 = vsyncadd [#allocation3], 4294967168 }
  0x10   :  { %354 = dma.done.wait [#allocation6], 2304  }
  0x11   :  { %355 = vsyncadd [#allocation6], 4294964992 }
  0x12   :  { %356 = dma.done.wait [#allocation9], 2048  }
  0x13   :  { %357 = vsyncadd [#allocation9], 4294965248  ;;  %v90_v0 = vld [vmem:[#allocation5 + $0x8] sm:$0xff]  ;;  %v89_v1 = vld [vmem:[#allocation5] sm:$0xff]  ;;  %vm95_vm0 = vcmask 130048   ;;  %s366_s24 = smov [#allocation10]  }
  0x14   :  { %113 = vmatpush.msra.mxu0 %v90_v0  ;;  %v88_v2 = vld [vmem:[#allocation2] sm:$0xff]  ;;  %v135_v3 = vld [vmem:[#allocation7 + $0x78] sm:$0xff]  ;;  %v134_v4 = vld [vmem:[#allocation7 + $0x70] sm:$0xff]  ;;  %s207_s25 = sshll.u32 %s366_s24, 4  ;;  %s209_s28 = sshll.u32 %s438_s7, 4  ;;  %s208_s25 = int_to_ptr.vmem [resolvable:$true] %s207_s25  ;;  %s210_s28 = int_to_ptr.hbm [resolvable:$true] %s209_s28 }
  0x15   :  { %140 = vmatpush.msra.mxu1 %v135_v3  ;;  %v133_v5 = vld [vmem:[#allocation7 + $0x68] sm:$0xff]  ;;  %v132_v6 = vld [vmem:[#allocation7 + $0x60] sm:$0xff]  ;;  %v131_v7 = vld [vmem:[#allocation7 + $0x58] sm:$0xff] }
  0x16   :  { %114 = vmatpush.msra.mxu0 %v89_v1  ;;  %v130_v8 = vld [vmem:[#allocation7 + $0x50] sm:$0xff]  ;;  %v129_v9 = vld [vmem:[#allocation7 + $0x48] sm:$0xff]  ;;  %v128_v10 = vld [vmem:[#allocation7 + $0x40] sm:$0xff] }
  0x17   :  { %221 = vmatmul.msk.f32.vlgmr.msra.gmra.mxu0 %vm95_vm0, %v88_v2  ;;  %141 = vmatpush.msra.mxu1 %v134_v4  ;;  %v127_v11 = vld [vmem:[#allocation7 + $0x38] sm:$0xff]  ;;  %v126_v12 = vld [vmem:[#allocation7 + $0x30] sm:$0xff]  ;;  %v125_v13 = vld [vmem:[#allocation7 + $0x28] sm:$0xff] }
  0x18   :  { %v124_v14 = vld [vmem:[#allocation7 + $0x20] sm:$0xff]  ;;  %v123_v15 = vld [vmem:[#allocation7 + $0x18] sm:$0xff]  ;;  %v122_v16 = vld [vmem:[#allocation7 + $0x10] sm:$0xff] }
  0x19   :  { %142 = vmatpush.msra.mxu1 %v133_v5  ;;  %v121_v17 = vld [vmem:[#allocation7 + $0x8] sm:$0xff]  ;;  %v120_v18 = vld [vmem:[#allocation7] sm:$0xff]  ;;  %v176_v19 = vld [vmem:[#allocation8 + $0x78] sm:$0xff] }
  0x1a   :  { %v175_v20 = vld [vmem:[#allocation8 + $0x70] sm:$0xff]  ;;  %181 = vmatpush.msra.mxu2 %v176_v19  ;;  %v174_v21 = vld [vmem:[#allocation8 + $0x68] sm:$0xff]  ;;  %v173_v22 = vld [vmem:[#allocation8 + $0x60] sm:$0xff] }
  0x1b   :  { %143 = vmatpush.msra.mxu1 %v132_v6  ;;  %v172_v23 = vld [vmem:[#allocation8 + $0x58] sm:$0xff]  ;;  %v171_v24 = vld [vmem:[#allocation8 + $0x50] sm:$0xff]  ;;  %v170_v25 = vld [vmem:[#allocation8 + $0x48] sm:$0xff] }
  0x1c   :  { %182 = vmatpush.msra.mxu2 %v175_v20  ;;  %v169_v26 = vld [vmem:[#allocation8 + $0x40] sm:$0xff]  ;;  %v168_v27 = vld [vmem:[#allocation8 + $0x38] sm:$0xff]  ;;  %v167_v28 = vld [vmem:[#allocation8 + $0x30] sm:$0xff] }
  0x1d   :  { %144 = vmatpush.msra.mxu1 %v131_v7  ;;  %v166_v29 = vld [vmem:[#allocation8 + $0x28] sm:$0xff]  ;;  %v165_v30 = vld [vmem:[#allocation8 + $0x20] sm:$0xff]  ;;  %v164_v31 = vld [vmem:[#allocation8 + $0x18] sm:$0xff] }
  0x1e   :  { %183 = vmatpush.msra.mxu2 %v174_v21  ;;  %v229_v32 = vld [vmem:[%s433_s2] ss:$0 sm:$0xff]  ;;  %v163_v36 = vld [vmem:[#allocation8 + $0x10] sm:$0xff]  ;;  %v161_v38 = vld [vmem:[#allocation8] sm:$0xff] }
  0x1f   :  { %145 = vmatpush.msra.mxu1 %v130_v8  ;;  %v162_v37 = vld [vmem:[#allocation8 + $0x8] sm:$0xff] }
  0x20   :  { %184 = vmatpush.msra.mxu2 %v173_v22  ;;  %v230_v39 = vld [vmem:[%s435_s4] ss:$0 sm:$0xff] }
  0x21   :  { %146 = vmatpush.msra.mxu1 %v129_v9  ;;  %v231_v43 = vld [vmem:[%s437_s6] ss:$0 sm:$0xff] }
  0x22   :  { %185 = vmatpush.msra.mxu2 %v172_v23 }
  0x23   :  { %147 = vmatpush.msra.mxu1 %v128_v10 }
  0x24   :  { %186 = vmatpush.msra.mxu2 %v171_v24 }
  0x25   :  { %148 = vmatpush.msra.mxu1 %v127_v11 }
  0x26   :  { %187 = vmatpush.msra.mxu2 %v170_v25 }
  0x27   :  { %149 = vmatpush.msra.mxu1 %v126_v12 }
  0x28   :  { %188 = vmatpush.msra.mxu2 %v169_v26 }
  0x29   :  { %150 = vmatpush.msra.mxu1 %v125_v13 }
  0x2a   :  { %189 = vmatpush.msra.mxu2 %v168_v27 }
  0x2b   :  { %151 = vmatpush.msra.mxu1 %v124_v14 }
  0x2c   :  { %190 = vmatpush.msra.mxu2 %v167_v28 }
  0x2d   :  { %152 = vmatpush.msra.mxu1 %v123_v15 }
  0x2e   :  { %191 = vmatpush.msra.mxu2 %v166_v29 }
  0x2f   :  { %153 = vmatpush.msra.mxu1 %v122_v16 }
  0x30   :  { %192 = vmatpush.msra.mxu2 %v165_v30 }
  0x31   :  { %154 = vmatpush.msra.mxu1 %v121_v17 }
  0x32   :  { %193 = vmatpush.msra.mxu2 %v164_v31 }
  0x33   :  { %155 = vmatpush.msra.mxu1 %v120_v18 }
  0x34   :  { %194 = vmatpush.msra.mxu2 %v163_v36 }
  0x36   :  { %195 = vmatpush.msra.mxu2 %v162_v37 }
  0x38   :  { %196 = vmatpush.msra.mxu2 %v161_v38 }
  0x94   :  { %v116_v33 = vpop.f32.mrf.mxu0 }
  0x95   :  { %v117_v34 = vadd.f32 %v229_v32, %v116_v33 }
  0x97   :  { %v119_v35 = vmin.f32 %v117_v34, 2.5 }
  0x99   :  { %156 = vmatmul.f32.vlgmr.msra.gmra.mxu1 %v119_v35 }
 0x116   :  { %v157_v40 = vpop.f32.mrf.mxu1 }
 0x117   :  { %v158_v41 = vadd.f32 %v230_v39, %v157_v40 }
 0x119   :  { %v160_v42 = vmin.f32 %v158_v41, 4.0 }
 0x11b   :  { %197 = vmatmul.f32.vlgmr.msra.gmra.mxu2 %v160_v42 }
 0x19e   :  { %v198_v44 = vpop.f32.mrf.mxu2 }
 0x19f   :  { %v199_v45 = vadd.f32 %v231_v43, %v198_v44 }
 0x1a1   :  { %201 = vst [vmem:[#allocation10] sm:$0xff] %v199_v45 }
 0x1a2   :  { %212 = dma.vmem_to_hbm [thread:$0]  %s208_s25, 128, %s210_s28, [#allocation4]  }
 0x1a3   :  { %358 = dma.done.wait [#allocation4], 128  }
 0x1a4   :  { %359 = vsyncadd [#allocation4], 4294967168 }
 0x1a5   :  { %217 = vsyncpa [#allocation3], 1 }
 0x1a6   :  { %218 = vsyncpa [#allocation6], 1 }
 0x1a7   :  { %219 = vsyncpa [#allocation9], 1 }
 0x1a8   :  { %220 = vsyncpa [#allocation4], 1 }

</bundles_post_ra>
